<compile_context>
chip_gen: v6e
topology: v6e:2x2x1
jax: 0.10.0
libtpu: 0.0.40
codegen_flags: <defaults>
</compile_context>

<pallas_src>
import functools

import jax
import jax.numpy as jnp
from jax.experimental import pallas as pl
from jax.experimental.pallas import tpu as pltpu


def _round_up(a, b):
    return ((a + b - 1) // b) * b


def _locked_dropout_kernel(seed_ref, x_ref, o_ref, *, keep_prob):
    # x_ref / o_ref block shape: (TT, CC) with columns = flattened (B, H).
    _, CC = x_ref.shape
    j = pl.program_id(1)                      # column-block index (often 0)

    # Mix the seed through a full avalanche round (fmix32-style).
    s = seed_ref[0].astype(jnp.uint32)
    s = s ^ (s >> 16)
    s = s * jnp.uint32(0x85EBCA6B)
    s = s ^ (s >> 13)
    s = s * jnp.uint32(0xC2B2AE35)
    s = s ^ (s >> 16)

    # Counter-based hash of the GLOBAL column index -> 32 bits per column.
    # Depends only on (seed, column), so the mask is identical for every row,
    # every row-block and every column-block: the "locked" dropout mask.
    col = jax.lax.broadcasted_iota(jnp.int32, (1, CC), 1) + j * CC
    h = col.astype(jnp.uint32) * jnp.uint32(0x9E3779B1) + s
    h = h ^ (h >> 16)
    h = h * jnp.uint32(0x7FEB352D)
    h = h ^ (h >> 15)
    h = h * jnp.uint32(0x846CA68B)
    h = h ^ (h >> 16)

    # Integer threshold compare: P(keep) = keep_prob (2^-24 resolution).
    threshold = jnp.uint32(int(keep_prob * float(1 << 24)))
    keep = (h & jnp.uint32(0x00FFFFFF)) < threshold

    # Inverted-dropout scaling, materialized in the output dtype.
    mask = jnp.where(keep, jnp.float32(1.0 / keep_prob),
                     jnp.float32(0.0)).astype(o_ref.dtype)

    o_ref[...] = x_ref[...] * mask            # (TT, CC) * (1, CC) broadcast


def locked_dropout(x, seed=0, dropout=0.5, training=True):
    """Pallas LockedDropout. x: (seq, batch, hidden)."""
    if (not training) or (dropout == 0.0):
        return x

    keep_prob = 1.0 - float(dropout)
    T, B, H = x.shape
    C = B * H
    x2 = x.reshape(T, C)                      # lane-dense layout

    itemsize = jnp.dtype(x.dtype).itemsize
    sublane = {1: 32, 2: 16}.get(itemsize, 8)  # native sublane tile per dtype
    BLOCK_TARGET = 4 << 20                     # ~4 MiB blocks (sweep 4-8 MiB)

    # Column tiling: keep the full lane-dense width unless it is so large that
    # even a sublane-high stripe would blow the block budget.
    if C > 128 and C * itemsize * sublane > 2 * BLOCK_TARGET:
        cc = max(128, ((BLOCK_TARGET // (sublane * itemsize)) // 128) * 128)
    else:
        cc = C

    # Row tiling: ~4 MiB blocks, sublane-aligned, and capped at ~T/2 so the
    # "parallel" grid has >= 2 steps when T allows (v7x has 2 TensorCores).
    target_rows = max(1, BLOCK_TARGET // (cc * itemsize))
    cap = _round_up(pl.cdiv(T, 2), sublane)
    tt = min(target_rows, cap)
    tt = max(sublane, (tt // sublane) * sublane)
    if tt >= T:
        tt = T
    grid = (pl.cdiv(T, tt), pl.cdiv(C, cc))

    # Generation-aware VMEM budget: 3/4 of physical, capped at 64 MiB
    # (-> ~48 MiB on v7x's 64 MiB/TC, 64 MiB on v5e/v6e's 128 MiB).
    try:
        vmem_cap = int(pltpu.get_tpu_info().vmem_capacity_bytes)
    except Exception:
        vmem_cap = 64 << 20
    vmem_limit = int(min((vmem_cap * 3) // 4, 64 << 20))

    # Seed travels as a (1,) int32 scalar-prefetch array (SMEM): no recompile
    # when the seed changes, and traced seeds under jit are fine.
    if isinstance(seed, int):
        seed = seed & 0x7FFFFFFF
    seed_arr = jnp.asarray(seed, dtype=jnp.int32).reshape((1,))

    kernel = functools.partial(_locked_dropout_kernel, keep_prob=keep_prob)

    y2 = pl.pallas_call(
        kernel,
        out_shape=jax.ShapeDtypeStruct((T, C), x.dtype),
        grid_spec=pltpu.PrefetchScalarGridSpec(
            num_scalar_prefetch=1,
            grid=grid,
            in_specs=[pl.BlockSpec((tt, cc), lambda t, j, seed: (t, j))],
            out_specs=pl.BlockSpec((tt, cc), lambda t, j, seed: (t, j)),
        ),
        compiler_params=pltpu.CompilerParams(
            dimension_semantics=("parallel", "parallel"),
            vmem_limit_bytes=vmem_limit,
        ),
    )(seed_arr, x2)

    return y2.reshape(T, B, H)


if __name__ == "__main__":
    key = jax.random.PRNGKey(0)
    T, B, H = 8, 4, 32                         # seq=8, batch=4, hidden=32
    x = jax.random.normal(key, (T, B, H), dtype=jnp.float32)

    dropout = 0.5
    y = jax.block_until_ready(
        locked_dropout(x, seed=1234, dropout=dropout, training=True))

    keep_prob = 1.0 - dropout
    # 1) output is elementwise either 0 or x / keep_prob
    ratio = jnp.where(x != 0, y / x, 0.0)
    ok_values = jnp.all(
        (jnp.abs(ratio) < 1e-6) | (jnp.abs(ratio - 1.0 / keep_prob) < 1e-4)
    )
    # 2) mask is "locked": zero-pattern identical across the seq axis
    zero_pattern = (y == 0.0) & (x != 0.0)
    locked = jnp.all(zero_pattern == zero_pattern[0:1])
    # 3) eval mode / dropout=0 is the identity
    y_eval = jax.block_until_ready(
        locked_dropout(x, seed=1234, dropout=dropout, training=False))
    identity_ok = jnp.array_equal(y_eval, x)

    if bool(ok_values) and bool(locked) and bool(identity_ok):
        print("KERNEL_OK")
    else:
        print("KERNEL_MISMATCH")
</pallas_src>

<mosaic_0001>
module attributes {stable_mosaic.version = 11 : i64} {
  func.func @_locked_dropout_kernel(%arg0: i32, %arg1: i32, %arg2: memref<1xi32, #tpu.memory_space<smem>>, %arg3: memref<8x128xf32, #tpu.memory_space<vmem>>, %arg4: memref<8x128xf32, #tpu.memory_space<vmem>>) attributes {dimension_semantics = [#tpu.dimension_semantics<parallel>, #tpu.dimension_semantics<parallel>], iteration_bounds = array<i64: 1, 1>, scalar_prefetch = 1 : i64, scratch_operands = 0 : i64, tpu.core_type = #tpu.core_type<tc>, window_params = [{transform_indices = @transform_0, window_bounds = array<i64: 8, 128>}, {transform_indices = @transform_1, window_bounds = array<i64: 8, 128>}]} {
    %c0 = arith.constant 0 : index
    %0 = memref.load %arg2[%c0] : memref<1xi32, #tpu.memory_space<smem>>
    %c16_i32 = arith.constant 16 : i32
    %1 = arith.shrui %0, %c16_i32 : i32
    %2 = arith.xori %0, %1 : i32
    %c-2048144789_i32 = arith.constant -2048144789 : i32
    %3 = arith.muli %2, %c-2048144789_i32 : i32
    %c13_i32 = arith.constant 13 : i32
    %4 = arith.shrui %3, %c13_i32 : i32
    %5 = arith.xori %3, %4 : i32
    %c-1028477387_i32 = arith.constant -1028477387 : i32
    %6 = arith.muli %5, %c-1028477387_i32 : i32
    %c16_i32_0 = arith.constant 16 : i32
    %7 = arith.shrui %6, %c16_i32_0 : i32
    %8 = arith.xori %6, %7 : i32
    %9 = tpu.iota {dimensions = array<i32: 1>} : vector<1x128xi32>
    %c128_i32 = arith.constant 128 : i32
    %10 = arith.muli %arg1, %c128_i32 : i32
    %11 = vector.broadcast %10 : i32 to vector<1x128xi32>
    %12 = arith.addi %9, %11 : vector<1x128xi32>
    %c-1640531535_i32 = arith.constant -1640531535 : i32
    %13 = vector.broadcast %c-1640531535_i32 : i32 to vector<1x128xi32>
    %14 = arith.muli %12, %13 : vector<1x128xi32>
    %15 = vector.broadcast %8 : i32 to vector<1x128xi32>
    %16 = arith.addi %14, %15 : vector<1x128xi32>
    %c16_i32_1 = arith.constant 16 : i32
    %17 = vector.broadcast %c16_i32_1 : i32 to vector<1x128xi32>
    %18 = arith.shrui %16, %17 : vector<1x128xi32>
    %19 = arith.xori %16, %18 : vector<1x128xi32>
    %c2146121005_i32 = arith.constant 2146121005 : i32
    %20 = vector.broadcast %c2146121005_i32 : i32 to vector<1x128xi32>
    %21 = arith.muli %19, %20 : vector<1x128xi32>
    %c15_i32 = arith.constant 15 : i32
    %22 = vector.broadcast %c15_i32 : i32 to vector<1x128xi32>
    %23 = arith.shrui %21, %22 : vector<1x128xi32>
    %24 = arith.xori %21, %23 : vector<1x128xi32>
    %c-2073254261_i32 = arith.constant -2073254261 : i32
    %25 = vector.broadcast %c-2073254261_i32 : i32 to vector<1x128xi32>
    %26 = arith.muli %24, %25 : vector<1x128xi32>
    %c16_i32_2 = arith.constant 16 : i32
    %27 = vector.broadcast %c16_i32_2 : i32 to vector<1x128xi32>
    %28 = arith.shrui %26, %27 : vector<1x128xi32>
    %29 = arith.xori %26, %28 : vector<1x128xi32>
    %c16777215_i32 = arith.constant 16777215 : i32
    %30 = vector.broadcast %c16777215_i32 : i32 to vector<1x128xi32>
    %31 = arith.andi %29, %30 : vector<1x128xi32>
    %c8388608_i32 = arith.constant 8388608 : i32
    %32 = vector.broadcast %c8388608_i32 : i32 to vector<1x128xi32>
    %33 = arith.cmpi ult, %31, %32 : vector<1x128xi32>
    %cst = arith.constant 2.000000e+00 : f32
    %cst_3 = arith.constant 0.000000e+00 : f32
    %34 = vector.broadcast %cst : f32 to vector<1x128xf32>
    %35 = vector.broadcast %cst_3 : f32 to vector<1x128xf32>
    %36 = arith.select %33, %34, %35 : vector<1x128xi1>, vector<1x128xf32>
    %c0_4 = arith.constant 0 : index
    %c0_5 = arith.constant 0 : index
    %37 = vector.load %arg3[%c0_4, %c0_5] : memref<8x128xf32, #tpu.memory_space<vmem>>, vector<8x128xf32>
    %38 = vector.broadcast %36 : vector<1x128xf32> to vector<8x128xf32>
    %39 = arith.mulf %37, %38 : vector<8x128xf32>
    %c0_6 = arith.constant 0 : index
    %c0_7 = arith.constant 0 : index
    %40 = vector.load %arg4[%c0_6, %c0_7] : memref<8x128xf32, #tpu.memory_space<vmem>>, vector<8x128xf32>
    tpu.vector_store %arg4[%c0_6, %c0_7], %39 {strides = array<i32>} : memref<8x128xf32, #tpu.memory_space<vmem>>, vector<8x128xf32>,
    return
  }
  func.func @transform_0(%arg0: i32, %arg1: i32, %arg2: memref<1xi32, #tpu.memory_space<smem>>) -> (i32, i32) {
    %c0_i32 = arith.constant 0 : i32
    return %arg0, %arg1 : i32, i32
  }
  func.func @transform_1(%arg0: i32, %arg1: i32, %arg2: memref<1xi32, #tpu.memory_space<smem>>) -> (i32, i32) {
    %c0_i32 = arith.constant 0 : i32
    return %arg0, %arg1 : i32, i32
  }
}

</mosaic_0001>

<bundles_post_ra>
// kernel: tpu_custom_call.1
= control target key start
LH: loop header
LB: loop body
LE: loop exit
PB: predicated region body
PF: predicated region fallthrough
CT: control target
= control target key end

     0   :  { %8 = vsyncpa [#allocation5], 0  ;;  %s146_s0 = inlined_call_operand.<no memory space> [shape: s32[1], index: 0, kind: input, shape index: {}]   ;;  %s147_s1 = inlined_call_operand.hbm [shape: f32[8,128], index: 1, kind: input, shape index: {}]   ;;  %s148_s2 = inlined_call_operand.hbm [shape: f32[8,128], index: 2, kind: output, shape index: {}]  }
   0x1   :  { %9 = vsyncpa [#allocation6], 0  ;;  %s116_s9 = smov [#allocation4]  }
   0x2   :  { %s16_s10 = sshll.u32 %s116_s9, 4  ;;  %s17_s10 = int_to_ptr.vmem [resolvable:$true] %s16_s10 }
   0x3   :  { %s80_s11 = scalar_lea.vmem %s17_s10, 128  ;;  %p85_p1 = scmp.lt.s32.totalorder %s17_s10, %s17_s10 }
   0x4   :  { %p81_p0 = scmp.ne.s32.totalorder %s17_s10, %s80_s11  ;;  %p86_p2 = scmp.lt.s32.totalorder %s80_s11, %s80_s11 }
   0x6   :  { %p87_p3 = por %p86_p2, %p85_p1 }
   0x8   :  { %p88_p4 = pnand %p87_p3, %p81_p0 }
   0xa   :  { %91 = shalt.err (!%p88_p4)
}
   0xb   :  { %19 = dma.hbm_to_vmem [thread:$0]  %s147_s1, 128, %s17_s10, [#allocation5]  }
   0xc   :  { %112 = dma.done.wait [#allocation5], 128  }
   0xd   :  { %113 = vsyncadd [#allocation5], 4294967168  ;;  %s24_s16 = sshrl.u32 %s146_s0, 16  ;;  %v32_v0 = vlaneseq  ;;  %v51_v14 = vld [vmem:[#allocation4] sm:$0xff]  ;;  %v118_v15 = vmov 0.0  }
   0xe   :  { %s25_s19 = sxor.u32 %s24_s16, %s146_s0  ;;  %s117_s0 = smov [#allocation7]  }
   0xf   :  { %s26_s20 = smul.u32 2246822507, %s25_s19  ;;  %v33_v1 = vand.u32 127, %v32_v0  ;;  %s60_s1 = sshll.u32 %s117_s0, 4  ;;  %s61_s1 = int_to_ptr.vmem [resolvable:$true] %s60_s1 }
  0x10   :  { %s92_s26 = scalar_lea.vmem %s61_s1, 128  ;;  %p97_p6 = scmp.lt.s32.totalorder %s61_s1, %s61_s1 }
  0x11   :  { %s27_s21 = sshrl.u32 %s26_s20, 13  ;;  %v37_v2 = vmul.u32 2654435761, %v33_v1  ;;  %p93_p5 = scmp.ne.s32.totalorder %s61_s1, %s92_s26 }
  0x12   :  { %s28_s22 = sxor.u32 %s27_s21, %s26_s20  ;;  %p98_p7 = scmp.lt.s32.totalorder %s92_s26, %s92_s26 }
  0x13   :  { %s29_s23 = smul.u32 3266489909, %s28_s22 }
  0x14   :  { %p99_p8 = por %p98_p7, %p97_p6 }
  0x15   :  { %s30_s24 = sshrl.u32 %s29_s23, 16 }
  0x16   :  { %s31_s25 = sxor.u32 %s30_s24, %s29_s23  ;;  %p100_p9 = pnand %p99_p8, %p93_p5 }
  0x17   :  { %v38_v3 = vstv %s31_s25 }
  0x18   :  { %v39_v4 = vadd.s32 %v38_v3, %v37_v2 }
  0x1a   :  { %v40_v5 = vshrl.u32 %v39_v4, 16 }
  0x1c   :  { %v41_v6 = vxor.u32 %v40_v5, %v39_v4 }
  0x1e   :  { %v42_v7 = vmul.u32 2146121005, %v41_v6 }
  0x20   :  { %v43_v8 = vshrl.u32 %v42_v7, 15 }
  0x22   :  { %v44_v9 = vxor.u32 %v43_v8, %v42_v7 }
  0x24   :  { %v45_v10 = vmul.u32 2221713035, %v44_v9 }
  0x26   :  { %v46_v11 = vshrl.u32 %v45_v10, 16 }
  0x28   :  { %v47_v12 = vxor.u32 %v46_v11, %v45_v10 }
  0x2a   :  { %v48_v13 = vand.u32 16777215, %v47_v12 }
  0x2c   :  { %vm49_vm0 = vcmp.lt.u32.totalorder %v48_v13, 8388608 }
  0x2d   :  { %v50_v16 = vsel %vm49_vm0, 2.0, %v118_v15 }
  0x2e   :  { %v52_v17 = vmul.f32 %v51_v14, %v50_v16 }
  0x30   :  { %53 = vst [vmem:[#allocation7] sm:$0xff] %v52_v17 }
  0x31   :  { %103 = shalt.err (!%p100_p9)
}
  0x32   :  { %63 = dma.vmem_to_hbm [thread:$0]  %s61_s1, 128, %s148_s2, [#allocation6]  }
  0x33   :  { %114 = dma.done.wait [#allocation6], 128  }
  0x34   :  { %115 = vsyncadd [#allocation6], 4294967168 }
  0x35   :  { %67 = vsyncpa [#allocation5], 1 }
  0x36   :  { %68 = vsyncpa [#allocation6], 1 }

</bundles_post_ra>
